<compile_context>
chip_gen: v7x
topology: tpu7x:2x2x1
jax: 0.10.0
libtpu: 0.0.40
codegen_flags: <defaults>
</compile_context>

<pallas_src>
import jax
import jax.numpy as jnp
from jax.experimental import pallas as pl
from jax.experimental.pallas import tpu as pltpu


def _round_up(x, m):
    return ((x + m - 1) // m) * m


def _patch_embed_kernel(x_ref, w_ref, b_ref, o_ref):
    # x_ref: (tm, K) bf16 patch tile; w_ref: (K, Ep) bf16; b_ref: (1, Ep) f32.
    acc = jnp.dot(x_ref[...], w_ref[...], preferred_element_type=jnp.float32)
    o_ref[...] = (acc + b_ref[...]).astype(o_ref.dtype)


def patch_embed(x_nchw, weight, bias, patch_size, *, tm=256, compute_dtype=jnp.bfloat16):
    """x_nchw: [B, C, H, W]; weight: [E, C, P, P] (Conv2d layout); bias: [E].

    Returns [B, N, E] with N = (H//P)*(W//P), matching PatchEmbed.forward with
    flatten=True and norm=Identity.
    """
    B, C, H, W = x_nchw.shape
    E = weight.shape[0]
    P = patch_size
    assert H % P == 0 and W % P == 0
    Hp, Wp = H // P, W // P
    N = Hp * Wp
    K = C * P * P
    M = B * N
    out_dtype = x_nchw.dtype

    # ---- layout glue (XLA): extract non-overlapping patches -> [M, K] ----
    # [B, C, Hp, P, Wp, P] -> [B, Hp, Wp, C, P, P] -> [M, K]
    xp = x_nchw.reshape(B, C, Hp, P, Wp, P)
    xp = jnp.transpose(xp, (0, 2, 4, 1, 3, 5))
    patches = xp.reshape(M, K).astype(compute_dtype)

    # Conv2d weight [E, C, P, P] -> matmul weight [K, E] in compute dtype; bias kept f32.
    w_mat = jnp.transpose(weight.reshape(E, K)).astype(compute_dtype)
    b_row = bias.astype(jnp.float32).reshape(1, E)

    # ---- pad to TPU-friendly tile sizes ----
    E_pad = _round_up(E, 128)                 # lane-dense output stores
    tm = max(16, _round_up(tm, 16))           # bf16 sublane packing
    tm_eff = min(tm, _round_up(M, 16))        # don't exceed (padded) problem size
    M_pad = _round_up(M, tm_eff)              # cdiv grid via zero-padding + slice

    if M_pad != M:
        patches = jnp.pad(patches, ((0, M_pad - M), (0, 0)))
    if E_pad != E:
        w_mat = jnp.pad(w_mat, ((0, 0), (0, E_pad - E)))
        b_row = jnp.pad(b_row, ((0, 0), (0, E_pad - E)))

    grid_m = M_pad // tm_eff

    # VMEM budget: double-buffered patch/out tiles + single-buffered weight/bias.
    in_itemsize = jnp.dtype(compute_dtype).itemsize
    out_itemsize = jnp.dtype(out_dtype).itemsize
    vmem_bytes = (2 * tm_eff * K * in_itemsize         # patch tiles (2 buffers)
                  + 2 * tm_eff * E_pad * out_itemsize  # output tiles (2 buffers)
                  + K * E_pad * in_itemsize            # weight (1 buffer)
                  + E_pad * 4)                         # bias (1 buffer)
    vmem_limit = int(min(max(2 * vmem_bytes, 4 * 1024 * 1024), 64 * 1024 * 1024))

    cost = pl.CostEstimate(
        flops=2 * M_pad * K * E_pad,
        transcendentals=0,
        bytes_accessed=(M_pad * K * in_itemsize
                        + K * E_pad * in_itemsize
                        + M_pad * E_pad * out_itemsize),
    )

    out = pl.pallas_call(
        _patch_embed_kernel,
        out_shape=jax.ShapeDtypeStruct((M_pad, E_pad), out_dtype),
        grid_spec=pltpu.PrefetchScalarGridSpec(
            num_scalar_prefetch=0,
            grid=(grid_m,),
            in_specs=[
                pl.BlockSpec((tm_eff, K), lambda i: (i, 0)),
                pl.BlockSpec((K, E_pad), lambda i: (0, 0),
                             pipeline_mode=pl.Buffered(1)),
                pl.BlockSpec((1, E_pad), lambda i: (0, 0),
                             pipeline_mode=pl.Buffered(1)),
            ],
            out_specs=pl.BlockSpec((tm_eff, E_pad), lambda i: (i, 0)),
        ),
        compiler_params=pltpu.CompilerParams(
            dimension_semantics=("parallel",),
            vmem_limit_bytes=vmem_limit,
        ),
        cost_estimate=cost,
    )(patches, w_mat, b_row)

    return out[:M, :E].reshape(B, N, E)


def _reference(x, weight, bias, P, quant_dtype):
    """lax strided-conv reference (same semantics as nn.Conv2d + flatten/transpose)."""
    xq = x.astype(quant_dtype).astype(jnp.float32)
    wq = weight.astype(quant_dtype).astype(jnp.float32)
    y = jax.lax.conv_general_dilated(
        xq, wq, window_strides=(P, P), padding="VALID",
        dimension_numbers=("NCHW", "OIHW", "NCHW"),
    ) + bias.astype(jnp.float32)[None, :, None, None]
    B, E = y.shape[0], y.shape[1]
    return jnp.transpose(y.reshape(B, E, -1), (0, 2, 1)).astype(x.dtype)


if __name__ == "__main__":
    key = jax.random.PRNGKey(0)

    # (B, C, H, W, P, E, tm) -- small shapes; exercise single-tile, multi-tile,
    # and remainder-padding paths.
    configs = [
        (2, 4, 16, 16, 4, 32, 256),  # M=32 -> one tile, E padded 32->128
        (2, 4, 16, 16, 4, 32, 16),   # M=32 -> grid of 2 tiles
        (2, 3, 20, 20, 4, 48, 16),   # M=50 -> padded to 64 rows (remainder masking)
    ]

    for idx, (B, C, H, W, P, E, tm) in enumerate(configs):
        kx, kw, kb = jax.random.split(jax.random.fold_in(key, idx), 3)
        x = jax.random.normal(kx, (B, C, H, W), dtype=jnp.float32)
        fan_in = C * P * P
        bound = 1.0 / (fan_in ** 0.5)
        weight = jax.random.uniform(kw, (E, C, P, P), jnp.float32, -bound, bound)
        bias = jax.random.uniform(kb, (E,), jnp.float32, -bound, bound)

        out = patch_embed(x, weight, bias, P, tm=tm)
        out = jax.block_until_ready(out)
        assert out.shape == (B, (H // P) * (W // P), E)

        # Exact-path check: same bf16-quantized operands, f32 accumulation.
        ref_q = _reference(x, weight, bias, P, jnp.bfloat16)
        assert jnp.allclose(out, ref_q, atol=1e-4, rtol=1e-4), \
            f"config {idx}: mismatch vs quantized reference"

        # Loose semantic check against the full-f32 conv (bf16 operand rounding only).
        ref_f32 = _reference(x, weight, bias, P, jnp.float32)
        assert jnp.allclose(out, ref_f32, atol=2e-2, rtol=2e-2), \
            f"config {idx}: mismatch vs f32 reference"

    print("KERNEL_OK")
</pallas_src>

<mosaic_0001>
module attributes {stable_mosaic.version = 11 : i64} {
  func.func @_patch_embed_kernel(%arg0: i32, %arg1: memref<32x64xbf16, #tpu.memory_space<vmem>>, %arg2: memref<64x128xbf16, #tpu.memory_space<vmem>>, %arg3: memref<1x128xf32, #tpu.memory_space<vmem>>, %arg4: memref<32x128xf32, #tpu.memory_space<vmem>>) attributes {dimension_semantics = [#tpu.dimension_semantics<parallel>], iteration_bounds = array<i64: 1>, scalar_prefetch = 0 : i64, scratch_operands = 0 : i64, tpu.core_type = #tpu.core_type<tc>, window_params = [{transform_indices = @transform_0, window_bounds = array<i64: 32, 64>}, {pipeline_mode = #tpu.pipeline_mode<synchronous>, transform_indices = @transform_1, window_bounds = array<i64: 64, 128>}, {pipeline_mode = #tpu.pipeline_mode<synchronous>, transform_indices = @transform_2, window_bounds = array<i64: 1, 128>}, {transform_indices = @transform_3, window_bounds = array<i64: 32, 128>}]} {
    %c0 = arith.constant 0 : index
    %c0_0 = arith.constant 0 : index
    %0 = vector.load %arg1[%c0, %c0_0] : memref<32x64xbf16, #tpu.memory_space<vmem>>, vector<32x64xbf16>
    %c0_1 = arith.constant 0 : index
    %c0_2 = arith.constant 0 : index
    %1 = vector.load %arg2[%c0_1, %c0_2] : memref<64x128xbf16, #tpu.memory_space<vmem>>, vector<64x128xbf16>
    %cst = arith.constant dense<0.000000e+00> : vector<32x128xf32>
    %2 = tpu.matmul %0, %1, %cst {dimension_numbers = #tpu.dot_dimension_numbers<[1], [0], [0], [1], [0, 0, 1, 1], [], []>} : vector<32x64xbf16>, vector<64x128xbf16>, vector<32x128xf32> -> vector<32x128xf32>
    %c0_3 = arith.constant 0 : index
    %c0_4 = arith.constant 0 : index
    %3 = vector.load %arg3[%c0_3, %c0_4] : memref<1x128xf32, #tpu.memory_space<vmem>>, vector<1x128xf32>
    %4 = vector.broadcast %3 : vector<1x128xf32> to vector<32x128xf32>
    %5 = arith.addf %2, %4 : vector<32x128xf32>
    %c0_5 = arith.constant 0 : index
    %c0_6 = arith.constant 0 : index
    %6 = vector.load %arg4[%c0_5, %c0_6] : memref<32x128xf32, #tpu.memory_space<vmem>>, vector<32x128xf32>
    tpu.vector_store %arg4[%c0_5, %c0_6], %5 {strides = array<i32>} : memref<32x128xf32, #tpu.memory_space<vmem>>, vector<32x128xf32>,
    return
  }
  func.func @transform_0(%arg0: i32) -> (i32, i32) {
    %c0_i32 = arith.constant 0 : i32
    %c0_i32_0 = arith.constant 0 : i32
    return %arg0, %c0_i32 : i32, i32
  }
  func.func @transform_1(%arg0: i32) -> (i32, i32) {
    %c0_i32 = arith.constant 0 : i32
    %c0_i32_0 = arith.constant 0 : i32
    %c0_i32_1 = arith.constant 0 : i32
    return %c0_i32, %c0_i32_0 : i32, i32
  }
  func.func @transform_2(%arg0: i32) -> (i32, i32) {
    %c0_i32 = arith.constant 0 : i32
    %c0_i32_0 = arith.constant 0 : i32
    %c0_i32_1 = arith.constant 0 : i32
    return %c0_i32, %c0_i32_0 : i32, i32
  }
  func.func @transform_3(%arg0: i32) -> (i32, i32) {
    %c0_i32 = arith.constant 0 : i32
    %c0_i32_0 = arith.constant 0 : i32
    return %arg0, %c0_i32 : i32, i32
  }
}

</mosaic_0001>

<bundles_post_ra>
// kernel: tpu_custom_call.1
= control target key start
LH: loop header
LB: loop body
LE: loop exit
PB: predicated region body
PF: predicated region fallthrough
CT: control target
= control target key end

     0   :  { %8 = vsyncpa [#allocation3], 0  ;;  %s353_s0 = inlined_call_operand.hbm [shape: bf16[32,64], index: 0, kind: input, shape index: {}]   ;;  %s354_s1 = inlined_call_operand.hbm [shape: bf16[64,128], index: 1, kind: input, shape index: {}]   ;;  %s355_s2 = inlined_call_operand.vmem [shape: f32[1,128], index: 2, kind: input, shape index: {}]   ;;  %s356_s3 = inlined_call_operand.hbm [shape: f32[32,128], index: 3, kind: output, shape index: {}]  }
   0x1   :  { %9 = vsyncpa [#allocation6], 0 }
   0x2   :  { %10 = vsyncpa [#allocation4], 0  ;;  %s287_s12 = smov [#allocation2]   ;;  %s215_s16 = scalar_lea.hbm %s353_s0, 256 }
   0x3   :  { %s16_s13 = sshll.u32 %s287_s12, 4  ;;  %p216_p0 = scmp.ne.s32.totalorder %s353_s0, %s215_s16  ;;  %s17_s13 = int_to_ptr.vmem [resolvable:$true] %s16_s13 }
   0x4   :  { %p219_p1 = scmp.lt.u32.totalorder %s215_s16, %s353_s0 }
   0x6   :  { %p221_p2 = pnand %p219_p1, %p216_p0 }
   0x8   :  { %224 = shalt.err (!%p221_p2)
}
   0x9   :  { %s225_s21 = scalar_lea.vmem %s17_s13, 256  ;;  %p230_p4 = scmp.lt.s32.totalorder %s17_s13, %s17_s13 }
   0xa   :  { %p226_p3 = scmp.ne.s32.totalorder %s17_s13, %s225_s21  ;;  %p231_p5 = scmp.lt.s32.totalorder %s225_s21, %s225_s21 }
   0xc   :  { %p232_p6 = por %p231_p5, %p230_p4 }
   0xe   :  { %p233_p7 = pnand %p232_p6, %p226_p3 }
  0x10   :  { %236 = shalt.err (!%p233_p7)
}
  0x11   :  { %s288_s22 = smov 64   ;;  %s289_s23 = smov 4  }
  0x12   :  { %22 = dma.hbm_to_vmem [thread:$0]  %s353_s0, 256, %s17_s13, [#allocation3], %s288_s22, %s288_s22, %s289_s23  }
  0x13   :  { %s290_s26 = smov [#allocation5]   ;;  %s237_s30 = scalar_lea.hbm %s354_s1, 512 }
  0x14   :  { %s28_s27 = sshll.u32 %s290_s26, 4  ;;  %p238_p8 = scmp.ne.s32.totalorder %s354_s1, %s237_s30  ;;  %s29_s27 = int_to_ptr.vmem [resolvable:$true] %s28_s27 }
  0x15   :  { %p241_p9 = scmp.lt.u32.totalorder %s237_s30, %s354_s1 }
  0x17   :  { %p243_p10 = pnand %p241_p9, %p238_p8 }
  0x19   :  { %246 = shalt.err (!%p243_p10)
}
  0x1a   :  { %s247_s8 = scalar_lea.vmem %s29_s27, 512  ;;  %p252_p12 = scmp.lt.s32.totalorder %s29_s27, %s29_s27 }
  0x1b   :  { %p248_p11 = scmp.ne.s32.totalorder %s29_s27, %s247_s8  ;;  %p253_p13 = scmp.lt.s32.totalorder %s247_s8, %s247_s8 }
  0x1d   :  { %p254_p0 = por %p253_p13, %p252_p12 }
  0x1f   :  { %p255_p1 = pnand %p254_p0, %p248_p11 }
  0x21   :  { %258 = shalt.err (!%p255_p1)
}
  0x22   :  { %34 = dma.hbm_to_vmem [thread:$0]  %s354_s1, 512, %s29_s27, [#allocation6], %s288_s22, %s288_s22, %s289_s23  }
  0x23   :  { %281 = dma.done.wait [#allocation3], 256  }
  0x24   :  { %282 = vsyncadd [#allocation3], 4294967040 }
  0x25   :  { %283 = dma.done.wait [#allocation6], 512  }
  0x26   :  { %284 = vsyncadd [#allocation6], 4294966784  ;;  %v209_v0 = vld [vmem:[#allocation5] sm:$0xff]   ;;  %v210_v1 = vld [vmem:[#allocation5 + $0x8] sm:$0xff]   ;;  %vm97_vm0 = vcmask 523264   ;;  %s291_s11 = smov [#allocation7]  }
  0x27   :  { %190 = vmatprep.subr.bf16.mxu0 %v209_v0  ;;  %v211_v2 = vld [vmem:[#allocation5 + $0x10] sm:$0xff]   ;;  %v212_v4 = vld [vmem:[#allocation5 + $0x18] sm:$0xff]   ;;  %s162_s12 = sshll.u32 %s291_s11, 4  ;;  %s163_s12 = int_to_ptr.vmem [resolvable:$true] %s162_s12 }
  0x28   :  { %191 = vmatpush3.bf16.msra.mxu0 %v209_v0  ;;  %v213_v3 = vld [vmem:[#allocation2] sm:$0xff]   ;;  %v214_v5 = vld [vmem:[#allocation2 + $0x8] sm:$0xff]   ;;  %s259_s13 = scalar_lea.vmem %s163_s12, 512  ;;  %p264_p3 = scmp.lt.s32.totalorder %s163_s12, %s163_s12 }
  0x29   :  { %192 = vmatprep.subr.bf16.mxu0 %v210_v1  ;;  %198 = vmatprep.mubr.msk.bf16.mxu0 %vm97_vm0, %v213_v3  ;;  %v175_v6 = vld [vmem:[%s355_s2] ss:$0 sm:$0xff]  ;;  %p260_p2 = scmp.ne.s32.totalorder %s163_s12, %s259_s13  ;;  %p265_p4 = scmp.lt.s32.totalorder %s259_s13, %s259_s13 }
  0x2b   :  { %p266_p5 = por %p265_p4, %p264_p3 }
  0x2c   :  { %193 = vmatpush3.bf16.msra.mxu0 %v210_v1 }
  0x2d   :  { %194 = vmatprep.subr.bf16.mxu0 %v211_v2  ;;  %p267_p6 = pnand %p266_p5, %p260_p2 }
  0x30   :  { %195 = vmatpush3.bf16.msra.mxu0 %v211_v2 }
  0x31   :  { %196 = vmatprep.subr.bf16.mxu0 %v212_v4 }
  0x34   :  { %197 = vmatpush3.bf16.msra.mxu0 %v212_v4 }
  0x37   :  { %199 = vmatmul.mubr.msk.bf16.vlgmr.msra.gmra.mrb[0].mxu0 %vm97_vm0, %v214_v5 }
 0x10a   :  { %v200_v7 = vpop.f32.mrb[0].mxu0 }
 0x10b   :  { %v147_v8 = vadd.f32 %v200_v7, %v175_v6  ;;  %v138_v9 = vpop.f32.mrb[1].mxu0 }
 0x10c   :  { %v139_v10 = vadd.f32 %v175_v6, %v138_v9  ;;  %v201_v11 = vpop.f32.mrb[2].mxu0 }
 0x10d   :  { %155 = vst [vmem:[#allocation7 + $0x10] sm:$0xff] %v147_v8  ;;  %v150_v12 = vadd.f32 %v201_v11, %v175_v6  ;;  %v141_v13 = vpop.f32.mrb[3].mxu0 }
 0x10e   :  { %153 = vst [vmem:[#allocation7] sm:$0xff] %v139_v10  ;;  %v142_v14 = vadd.f32 %v175_v6, %v141_v13 }
 0x10f   :  { %156 = vst [vmem:[#allocation7 + $0x18] sm:$0xff] %v150_v12 }
 0x110   :  { %154 = vst [vmem:[#allocation7 + $0x8] sm:$0xff] %v142_v14 }
 0x111   :  { %270 = shalt.err (!%p267_p6)
}
 0x112   :  { %s271_s15 = scalar_lea.hbm %s356_s3, 512 }
 0x113   :  { %p272_p7 = scmp.ne.s32.totalorder %s356_s3, %s271_s15  ;;  %p275_p8 = scmp.lt.u32.totalorder %s271_s15, %s356_s3 }
 0x115   :  { %p277_p9 = pnand %p275_p8, %p272_p7 }
 0x117   :  { %280 = shalt.err (!%p277_p9)
}
 0x118   :  { %s292_s20 = smov 128   ;;  %s293_s21 = smov 8  }
 0x119   :  { %168 = dma.vmem_to_hbm [thread:$0]  %s163_s12, 512, %s356_s3, [#allocation4], %s292_s20, %s292_s20, %s293_s21  }
 0x11a   :  { %285 = dma.done.wait [#allocation4], 512  }
 0x11b   :  { %286 = vsyncadd [#allocation4], 4294966784 }
 0x11c   :  { %172 = vsyncpa [#allocation3], 1 }
 0x11d   :  { %173 = vsyncpa [#allocation6], 1 }
 0x11e   :  { %174 = vsyncpa [#allocation4], 1 }

</bundles_post_ra>
